<compile_context>
chip_gen: v7x
topology: tpu7x:2x2x1
jax: 0.10.0
libtpu: 0.0.40
codegen_flags: <defaults>
</compile_context>

<pallas_src>
import functools

import jax
import jax.numpy as jnp
from jax.experimental import pallas as pl
from jax.experimental.pallas import tpu as pltpu

D_IN, D_HID, D_OUT = 20, 256, 10


def mlp_kernel(x_ref, w1_ref, b1_ref, w2_ref, b2_ref, o_ref, *, compute_dtype):
    # hidden = relu(x @ W1 + b1); MXU inputs in compute_dtype, f32 accumulate.
    h = jnp.dot(x_ref[...].astype(compute_dtype),
                w1_ref[...].astype(compute_dtype),
                preferred_element_type=jnp.float32)
    h = jnp.maximum(h + b1_ref[...], 0.0)          # f32 elementwise (v5e-safe)
    # out = h @ W2 + b2 ; h feeds dot2 directly (no VMEM round-trip).
    y = jnp.dot(h.astype(compute_dtype), w2_ref[...].astype(compute_dtype),
                preferred_element_type=jnp.float32)
    o_ref[...] = (y + b2_ref[...]).astype(o_ref.dtype)


def mlp_block(x, w1, b1, w2, b2, *, tb=2048, compute_dtype=jnp.bfloat16):
    """relu(x @ w1 + b1) @ w2 + b2 as one batch-tiled pallas_call.

    x: (B, 20), w1: (20, 256), b1: (1, 256), w2: (256, 10), b2: (1, 10).
    Returns (B, 10).
    """
    B, d_in = x.shape
    assert d_in == D_IN and w1.shape == (D_IN, D_HID)
    assert b1.shape == (1, D_HID)
    assert w2.shape == (D_HID, D_OUT) and b2.shape == (1, D_OUT)

    # Batch tile: multiple of 8, capped so the grid has >= 2 steps whenever
    # B > 8 (so the "parallel" axis can shard across both v7x TensorCores).
    tb = max(8, min(tb, ((B + 15) // 16) * 8))
    b_pad = pl.cdiv(B, tb) * tb
    if b_pad != B:
        x = jnp.pad(x, ((0, b_pad - B), (0, 0)))

    itemsize = jnp.dtype(x.dtype).itemsize
    flops = 2 * b_pad * (D_IN * D_HID + D_HID * D_OUT)
    bytes_accessed = (
        b_pad * D_IN * itemsize                     # x streamed in
        + b_pad * D_OUT * itemsize                  # unpadded output stream
        + (w1.size + b1.size + w2.size + b2.size) * 4)  # resident params

    out = pl.pallas_call(
        functools.partial(mlp_kernel, compute_dtype=compute_dtype),
        out_shape=jax.ShapeDtypeStruct((b_pad, D_OUT), x.dtype),
        grid=(b_pad // tb,),
        in_specs=[
            pl.BlockSpec((tb, D_IN), lambda i: (i, 0)),       # x: per-tile
            pl.BlockSpec((D_IN, D_HID), lambda i: (0, 0)),    # weights stay
            pl.BlockSpec((1, D_HID), lambda i: (0, 0)),       # VMEM-resident
            pl.BlockSpec((D_HID, D_OUT), lambda i: (0, 0)),
            pl.BlockSpec((1, D_OUT), lambda i: (0, 0)),
        ],
        out_specs=pl.BlockSpec((tb, D_OUT), lambda i: (i, 0)),
        compiler_params=pltpu.CompilerParams(
            dimension_semantics=("parallel",),
            vmem_limit_bytes=32 << 20),
        cost_estimate=pl.CostEstimate(
            flops=flops, transcendentals=0, bytes_accessed=bytes_accessed),
    )(x, w1, b1, w2, b2)

    return out[:B] if b_pad != B else out


def reference_mlp(x, w1, b1, w2, b2):
    h = jnp.maximum(x @ w1 + b1, 0.0)
    return h @ w2 + b2


if __name__ == "__main__":
    key = jax.random.PRNGKey(0)
    k_x, k_w1, k_b1, k_w2, k_b2 = jax.random.split(key, 5)

    # Small batch; tb clamp makes this run as 2 grid tiles of 32 rows each.
    B = 64
    x = jax.random.normal(k_x, (B, D_IN), dtype=jnp.float32)
    # Deterministic synthetic parameters (shapes per nn.Linear(20,256)/(256,10)).
    w1 = jax.random.normal(k_w1, (D_IN, D_HID), dtype=jnp.float32) * 0.05
    b1 = jax.random.normal(k_b1, (1, D_HID), dtype=jnp.float32) * 0.05
    w2 = jax.random.normal(k_w2, (D_HID, D_OUT), dtype=jnp.float32) * 0.05
    b2 = jax.random.normal(k_b2, (1, D_OUT), dtype=jnp.float32) * 0.05

    ref = reference_mlp(x, w1, b1, w2, b2)

    # Default fast path: bf16 MXU inputs, f32 accumulation.
    out = jax.block_until_ready(mlp_block(x, w1, b1, w2, b2))
    assert out.shape == (B, D_OUT)
    assert jnp.allclose(out, ref, atol=2e-2, rtol=2e-2), "bf16 path mismatch"

    # Exact f32 path for a tight numerical check of the kernel structure.
    out_f32 = jax.block_until_ready(
        mlp_block(x, w1, b1, w2, b2, compute_dtype=jnp.float32))
    assert jnp.allclose(out_f32, ref, atol=1e-5, rtol=1e-5), "f32 path mismatch"

    print("KERNEL_OK")
</pallas_src>

<mosaic_0001>
module attributes {stable_mosaic.version = 11 : i64} {
  func.func @mlp_kernel(%arg0: i32, %arg1: memref<32x20xf32, #tpu.memory_space<vmem>>, %arg2: memref<20x256xf32, #tpu.memory_space<vmem>>, %arg3: memref<1x256xf32, #tpu.memory_space<vmem>>, %arg4: memref<256x10xf32, #tpu.memory_space<vmem>>, %arg5: memref<1x10xf32, #tpu.memory_space<vmem>>, %arg6: memref<32x10xf32, #tpu.memory_space<vmem>>) attributes {dimension_semantics = [#tpu.dimension_semantics<parallel>], iteration_bounds = array<i64: 2>, scalar_prefetch = 0 : i64, scratch_operands = 0 : i64, tpu.core_type = #tpu.core_type<tc>, window_params = [{transform_indices = @transform_0, window_bounds = array<i64: 32, 20>}, {pipeline_mode = #tpu.pipeline_mode<synchronous>, transform_indices = @transform_1, window_bounds = array<i64: 20, 256>}, {pipeline_mode = #tpu.pipeline_mode<synchronous>, transform_indices = @transform_2, window_bounds = array<i64: 1, 256>}, {pipeline_mode = #tpu.pipeline_mode<synchronous>, transform_indices = @transform_3, window_bounds = array<i64: 256, 10>}, {pipeline_mode = #tpu.pipeline_mode<synchronous>, transform_indices = @transform_4, window_bounds = array<i64: 1, 10>}, {transform_indices = @transform_5, window_bounds = array<i64: 32, 10>}]} {
    %c0 = arith.constant 0 : index
    %c0_0 = arith.constant 0 : index
    %0 = vector.load %arg1[%c0, %c0_0] : memref<32x20xf32, #tpu.memory_space<vmem>>, vector<32x20xf32>
    %1 = arith.truncf %0 : vector<32x20xf32> to vector<32x20xbf16>
    %c0_1 = arith.constant 0 : index
    %c0_2 = arith.constant 0 : index
    %2 = vector.load %arg2[%c0_1, %c0_2] : memref<20x256xf32, #tpu.memory_space<vmem>>, vector<20x256xf32>
    %3 = arith.truncf %2 : vector<20x256xf32> to vector<20x256xbf16>
    %cst = arith.constant dense<0.000000e+00> : vector<32x256xf32>
    %4 = tpu.matmul %1, %3, %cst {dimension_numbers = #tpu.dot_dimension_numbers<[1], [0], [0], [1], [0, 0, 1, 1], [], []>} : vector<32x20xbf16>, vector<20x256xbf16>, vector<32x256xf32> -> vector<32x256xf32>
    %c0_3 = arith.constant 0 : index
    %c0_4 = arith.constant 0 : index
    %5 = vector.load %arg3[%c0_3, %c0_4] : memref<1x256xf32, #tpu.memory_space<vmem>>, vector<1x256xf32>
    %6 = vector.broadcast %5 : vector<1x256xf32> to vector<32x256xf32>
    %7 = arith.addf %4, %6 : vector<32x256xf32>
    %cst_5 = arith.constant 0.000000e+00 : f32
    %8 = vector.broadcast %cst_5 : f32 to vector<32x256xf32>
    %9 = arith.maximumf %7, %8 : vector<32x256xf32>
    %10 = arith.truncf %9 : vector<32x256xf32> to vector<32x256xbf16>
    %c0_6 = arith.constant 0 : index
    %c0_7 = arith.constant 0 : index
    %11 = vector.load %arg4[%c0_6, %c0_7] : memref<256x10xf32, #tpu.memory_space<vmem>>, vector<256x10xf32>
    %12 = arith.truncf %11 : vector<256x10xf32> to vector<256x10xbf16>
    %cst_8 = arith.constant dense<0.000000e+00> : vector<32x10xf32>
    %13 = tpu.matmul %10, %12, %cst_8 {dimension_numbers = #tpu.dot_dimension_numbers<[1], [0], [0], [1], [0, 0, 1, 1], [], []>} : vector<32x256xbf16>, vector<256x10xbf16>, vector<32x10xf32> -> vector<32x10xf32>
    %c0_9 = arith.constant 0 : index
    %c0_10 = arith.constant 0 : index
    %14 = vector.load %arg5[%c0_9, %c0_10] : memref<1x10xf32, #tpu.memory_space<vmem>>, vector<1x10xf32>
    %15 = vector.broadcast %14 : vector<1x10xf32> to vector<32x10xf32>
    %16 = arith.addf %13, %15 : vector<32x10xf32>
    %c0_11 = arith.constant 0 : index
    %c0_12 = arith.constant 0 : index
    %17 = vector.load %arg6[%c0_11, %c0_12] : memref<32x10xf32, #tpu.memory_space<vmem>>, vector<32x10xf32>
    tpu.vector_store %arg6[%c0_11, %c0_12], %16 {strides = array<i32>} : memref<32x10xf32, #tpu.memory_space<vmem>>, vector<32x10xf32>,
    return
  }
  func.func @transform_0(%arg0: i32) -> (i32, i32) {
    %c0_i32 = arith.constant 0 : i32
    %c0_i32_0 = arith.constant 0 : i32
    return %arg0, %c0_i32 : i32, i32
  }
  func.func @transform_1(%arg0: i32) -> (i32, i32) {
    %c0_i32 = arith.constant 0 : i32
    %c0_i32_0 = arith.constant 0 : i32
    %c0_i32_1 = arith.constant 0 : i32
    return %c0_i32, %c0_i32_0 : i32, i32
  }
  func.func @transform_2(%arg0: i32) -> (i32, i32) {
    %c0_i32 = arith.constant 0 : i32
    %c0_i32_0 = arith.constant 0 : i32
    %c0_i32_1 = arith.constant 0 : i32
    return %c0_i32, %c0_i32_0 : i32, i32
  }
  func.func @transform_3(%arg0: i32) -> (i32, i32) {
    %c0_i32 = arith.constant 0 : i32
    %c0_i32_0 = arith.constant 0 : i32
    %c0_i32_1 = arith.constant 0 : i32
    return %c0_i32, %c0_i32_0 : i32, i32
  }
  func.func @transform_4(%arg0: i32) -> (i32, i32) {
    %c0_i32 = arith.constant 0 : i32
    %c0_i32_0 = arith.constant 0 : i32
    %c0_i32_1 = arith.constant 0 : i32
    return %c0_i32, %c0_i32_0 : i32, i32
  }
  func.func @transform_5(%arg0: i32) -> (i32, i32) {
    %c0_i32 = arith.constant 0 : i32
    %c0_i32_0 = arith.constant 0 : i32
    return %arg0, %c0_i32 : i32, i32
  }
}

</mosaic_0001>

<bundles_post_ra>
// kernel: tpu_custom_call.1
= control target key start
LH: loop header
LB: loop body
LE: loop exit
PB: predicated region body
PF: predicated region fallthrough
CT: control target
= control target key end

     0   :  { %s592_s18 = smov 0   ;;  %s744_s0 = inlined_call_operand.vmem [shape: f32[64,20], index: 0, kind: input, shape index: {}]   ;;  %s745_s1 = inlined_call_operand.vmem [shape: f32[20,256], index: 1, kind: input, shape index: {}]   ;;  %s746_s2 = inlined_call_operand.vmem [shape: f32[1,256], index: 2, kind: input, shape index: {}]   ;;  %s747_s3 = inlined_call_operand.vmem [shape: f32[256,10], index: 3, kind: input, shape index: {}]   ;;  %s748_s4 = inlined_call_operand.vmem [shape: f32[1,10], index: 4, kind: input, shape index: {}]   ;;  %s749_s5 = inlined_call_operand.vmem [shape: f32[64,10], index: 5, kind: output, shape index: {}]  }
   0x1 LB: > { %s501_s19 = sadd.s32 4294967295, %s559_s18   ;;  %p505_p0 = scmp.ge.s32.totalorder %s559_s18, 1  ;;  %s559_s18 = sphi %s592_s18, %s15_s18  }
   0x2   : > { %p188_p1 = scmp.lt.s32.totalorder %s559_s18, 3 }
   0x4   : > { %p189_p2 = pnand %p505_p0, %p188_p1 }
   0x5   : > { %v236_v0 = vld [vmem:[%s745_s1 + $0x8] sm:$0xff] (!%p189_p2)  ;;  %v238_v1 = vld [vmem:[%s745_s1 + $0x18] sm:$0xff] (!%p189_p2)  ;;  %v235_v2 = vld [vmem:[%s745_s1] sm:$0xff] (!%p189_p2)  ;;  %s506_s26 = sshll.u32 (!%p189_p2), %s501_s19, 2  ;;  %v561_v7 = vmov (!%p189_p2), 0   ;;  %vm264_vm0 = vcmask (!%p189_p2), 1041408  }
   0x6   : > { %192 = sbr.rel (%p189_p2) target bundleno = 469 (0x1d5), region = 40  ;;  %v242_v3 = vpack.c.bf16 (!%p189_p2), %v238_v1, %v236_v0  ;;  %v237_v4 = vld [vmem:[%s745_s1 + $0x10] sm:$0xff] (!%p189_p2)  ;;  %v240_v5 = vld [vmem:[%s745_s1 + $0x28] sm:$0xf] (!%p189_p2)  ;;  %v239_v6 = vld [vmem:[%s745_s1 + $0x20] sm:$0xf] (!%p189_p2)  ;;  %303 = vmatprep.mubr.bf16.mxu0 (!%p189_p2), %v561_v7 }
   0x7   : > { %p217_p3 = scmp.lt.s32.totalorder (!%p189_p2), %s506_s26, 7  ;;  %v241_v8 = vpack.c.bf16 (!%p189_p2), %v237_v4, %v235_v2  ;;  %v244_v9 = vpack.c.bf16 (!%p189_p2), %v240_v5, %v240_v5  ;;  %v243_v10 = vpack.c.bf16 (!%p189_p2), %v239_v6, %v239_v6  ;;  %v352_v11 = vld [vmem:[%s747_s3 + $0x80] sm:$0xff] (!%p189_p2)  ;;  %v353_v12 = vld [vmem:[%s747_s3 + $0x88] sm:$0xff] (!%p189_p2)  ;;  %v354_v16 = vld [vmem:[%s747_s3 + $0x90] sm:$0xff] (!%p189_p2)  ;;  %vm257_vm1 = vcmask (!%p189_p2), 162816  }
   0x8   : > { %v336_v13 = vld [vmem:[%s747_s3] sm:$0xff] (!%p189_p2)  ;;  %271 = vmatprep.subr.bf16.mxu0 (!%p189_p2), %v242_v3  ;;  %v376_v14 = vpack.c.bf16 (!%p189_p2), %v353_v12, %v352_v11  ;;  %v337_v15 = vld [vmem:[%s747_s3 + $0x8] sm:$0xff] (!%p189_p2)  ;;  %v355_v17 = vld [vmem:[%s747_s3 + $0x98] sm:$0xff] (!%p189_p2)  ;;  %v247_v2 = vlaneseq (!%p189_p2)  ;;  %vm440_vm2 = vcmask (!%p189_p2), 80896  }
   0x9   : > { %272 = vmatpush1.bf16.msra.mxu0 (!%p189_p2), %v241_v8  ;;  %v368_v18 = vpack.c.bf16 (!%p189_p2), %v337_v15, %v336_v13  ;;  %v377_v19 = vpack.c.bf16 (!%p189_p2), %v355_v17, %v354_v16  ;;  %v338_v20 = vld [vmem:[%s747_s3 + $0x10] sm:$0xff] (!%p189_p2)  ;;  %v339_v21 = vld [vmem:[%s747_s3 + $0x18] sm:$0xff] (!%p189_p2)  ;;  %v356_v22 = vld [vmem:[%s747_s3 + $0xa0] sm:$0xff] (!%p189_p2)  ;;  %v266_v23 = vsel (!%p189_p2), %vm264_vm0, %v243_v10, 0 }
   0xa   : > { %510 = vmatprep.subr.msk.bf16.mxu0 (!%p189_p2), %vm264_vm0, %v244_v9  ;;  %516 = vmatprep.subr.bf16.mxu1 (!%p189_p2), %v376_v14  ;;  %v357_v24 = vld [vmem:[%s747_s3 + $0xa8] sm:$0xff] (!%p189_p2)  ;;  %v369_v25 = vpack.c.bf16 (!%p189_p2), %v339_v21, %v338_v20  ;;  %v340_v26 = vld [vmem:[%s747_s3 + $0x20] sm:$0xff] (!%p189_p2)  ;;  %v358_v32 = vld [vmem:[%s747_s3 + $0xb0] sm:$0xff] (!%p189_p2)  ;;  %v248_v3 = vshrl.u32 (!%p189_p2), %v247_v2, 7 }
   0xb   : > { %517 = vmatpush3.bf16.msra.mxu1 (!%p189_p2), %v368_v18  ;;  %v378_v29 = vpack.c.bf16 (!%p189_p2), %v357_v24, %v356_v22  ;;  %v341_v30 = vld [vmem:[%s747_s3 + $0x28] sm:$0xff] (!%p189_p2)  ;;  %v359_v33 = vld [vmem:[%s747_s3 + $0xb8] sm:$0xff] (!%p189_p2)  ;;  %v342_v37 = vld [vmem:[%s747_s3 + $0x30] sm:$0xff] (!%p189_p2) }
   0xc   : > { %518 = vmatprep.subr.bf16.mxu1 (!%p189_p2), %v377_v19  ;;  %v370_v34 = vpack.c.bf16 (!%p189_p2), %v341_v30, %v340_v26  ;;  %v379_v36 = vpack.c.bf16 (!%p189_p2), %v359_v33, %v358_v32  ;;  %v343_v38 = vld [vmem:[%s747_s3 + $0x38] sm:$0xff] (!%p189_p2)  ;;  %v360_v40 = vld [vmem:[%s747_s3 + $0xc0] sm:$0xff] (!%p189_p2)  ;;  %v361_v41 = vld [vmem:[%s747_s3 + $0xc8] sm:$0xff] (!%p189_p2)  ;;  %v249_v4 = vsub.s32 (!%p189_p2), 0, %v248_v3  ;;  %v253_v6 = vsub.s32 (!%p189_p2), 1, %v248_v3 }
   0xd   : > { %s751_s26 = smov (!%p217_p3, %s506_s26), 7  ;;  %274 = vmatpush1.bf16.msra.mxu0 %v266_v23  ;;  %v371_v42 = vpack.c.bf16 %v343_v38, %v342_v37  ;;  %v380_v44 = vpack.c.bf16 %v361_v41, %v360_v40  ;;  %v344_v45 = vld [vmem:[%s747_s3 + $0x40] sm:$0xff]  ;;  %v345_v46 = vld [vmem:[%s747_s3 + $0x48] sm:$0xff]  ;;  %v362_v47 = vld [vmem:[%s747_s3 + $0xd0] sm:$0xff] }
   0xe   : > { %s507_s28 = sshll.u32 %s751_s26, 3  ;;  %v363_v48 = vld [vmem:[%s747_s3 + $0xd8] sm:$0xff]  ;;  %v372_v49 = vpack.c.bf16 %v345_v46, %v344_v45  ;;  %v346_v51 = vld [vmem:[%s747_s3 + $0x50] sm:$0xff]  ;;  %v364_v54 = vld [vmem:[%s747_s3 + $0xe0] sm:$0xff] }
   0xf   : > { %s220_s8 = scalar_lea.vmem %s744_s0, %s507_s28  ;;  %519 = vmatpush3.bf16.msra.mxu1 %v369_v25  ;;  %v381_v50 = vpack.c.bf16 %v363_v48, %v362_v47  ;;  %v347_v52 = vld [vmem:[%s747_s3 + $0x58] sm:$0xff]  ;;  %v365_v55 = vld [vmem:[%s747_s3 + $0xe8] sm:$0xff]  ;;  %v348_v57 = vld [vmem:[%s747_s3 + $0x60] sm:$0xff]  ;;  %s226_s15 = scalar_lea.vmem %s749_s5, %s507_s28 }
  0x10   : > { %v229_v27 = vld [vmem:[%s220_s8] sm:$0xff]  ;;  %v230_v28 = vld [vmem:[%s220_s8 + $0x8] sm:$0xff]  ;;  %v231_v35 = vld [vmem:[%s220_s8 + $0x10] sm:$0xff]  ;;  %520 = vmatprep.subr.bf16.mxu1 %v378_v29  ;;  %v373_v53 = vpack.c.bf16 %v347_v52, %v346_v51  ;;  %v382_v56 = vpack.c.bf16 %v365_v55, %v364_v54 }
  0x11   : > { %v233_v31 = vpack.c.bf16 %v230_v28, %v229_v27  ;;  %v232_v39 = vld [vmem:[%s220_s8 + $0x18] sm:$0xff]  ;;  %v349_v58 = vld [vmem:[%s747_s3 + $0x68] sm:$0xff]  ;;  %v366_v60 = vld [vmem:[%s747_s3 + $0xf0] sm:$0xff] }
  0x12   : > { %v234_v43 = vpack.c.bf16 %v232_v39, %v231_v35  ;;  %v374_v59 = vpack.c.bf16 %v349_v58, %v348_v57  ;;  %v367_v61 = vld [vmem:[%s747_s3 + $0xf8] sm:$0xff]  ;;  %v350_v63 = vld [vmem:[%s747_s3 + $0x70] sm:$0xff]  ;;  %v245_v5 = vld [vmem:[%s746_s2] sm:$0x3] }
  0x13   : > { %511 = vmatmul.mubr.msk.bf16.vlgmr.msra.gmra.mrb[0].mxu0 %vm257_vm1, %v233_v31  ;;  %521 = vmatpush3.bf16.msra.mxu1 %v370_v34  ;;  %v383_v62 = vpack.c.bf16 %v367_v61, %v366_v60  ;;  %v351_v0 = vld [vmem:[%s747_s3 + $0x78] sm:$0xff]  ;;  %v254_v8 = vrot.slane %v245_v5, %v253_v6  ;;  %v513_v38 = vld [vmem:[%s748_s4] ss:$0 sm:$0xff] }
  0x14   : > { %313 = vmatprep.mubr.bf16.mxu0 %v561_v7  ;;  %522 = vmatprep.subr.bf16.mxu1 %v379_v36  ;;  %v375_v1 = vpack.c.bf16 %v351_v0, %v350_v63  ;;  %v250_v7 = vrot.slane %v245_v5, %v249_v4 }
  0x17   : > { %523 = vmatpush3.bf16.msra.mxu1 %v371_v42 }
  0x18   : > { %524 = vmatprep.subr.bf16.mxu1 %v380_v44 }
  0x1b   : > { %512 = vmatmul.mubr.msk.bf16.gmra.mrb[4].mxu0 %vm257_vm1, %v234_v43  ;;  %525 = vmatpush3.bf16.msra.mxu1 %v372_v49 }
  0x1c   : > { %526 = vmatprep.subr.bf16.mxu1 %v381_v50 }
  0x1f   : > { %527 = vmatpush3.bf16.msra.mxu1 %v373_v53 }
  0x20   : > { %528 = vmatprep.subr.bf16.mxu1 %v382_v56 }
  0x23   : > { %529 = vmatpush3.bf16.msra.mxu1 %v374_v59 }
  0x24   : > { %530 = vmatprep.subr.bf16.mxu1 %v383_v62 }
  0x27   : > { %531 = vmatpush3.bf16.msra.mxu1 %v375_v1 }
  0xe6   : > { %v305_v9 = vpop.f32.mrb[0].mxu0 }
  0xe7   : > { %v306_v10 = vadd.f32 %v305_v9, %v250_v7  ;;  %v307_v11 = vpop.f32.mrb[1].mxu0 }
  0xe8   : > { %v308_v12 = vadd.f32 %v307_v11, %v254_v8  ;;  %v309_v13 = vpop.f32.mrb[2].mxu0 }
  0xe9   : > { %v310_v14 = vadd.f32 %v309_v13, %v250_v7  ;;  %v311_v15 = vpop.f32.mrb[3].mxu0  ;;  %v324_v17 = vmax.f32 %v306_v10, 0.0 }
  0xea   : > { %v312_v16 = vadd.f32 %v311_v15, %v254_v8  ;;  %v325_v19 = vmax.f32 %v308_v12, 0.0 }
  0xeb   : > { %v326_v18 = vmax.f32 %v310_v14, 0.0 }
  0xec   : > { %v327_v20 = vmax.f32 %v312_v16, 0.0 }
  0xed   : > { %v332_v21 = vpack.c.bf16 %v326_v18, %v324_v17 }
  0xee   : > { %v315_v22 = vpop.f32.mrb[4].mxu0  ;;  %v333_v23 = vpack.c.bf16 %v327_v20, %v325_v19 }
  0xef   : > { %v316_v24 = vadd.f32 %v315_v22, %v250_v7  ;;  %v317_v25 = vpop.f32.mrb[5].mxu0 }
  0xf0   : > { %v318_v26 = vadd.f32 %v317_v25, %v254_v8  ;;  %v319_v27 = vpop.f32.mrb[6].mxu0  ;;  %423 = vmatprep.mubr.bf16.mxu1 %v333_v23 }
  0xf1   : > { %v320_v28 = vadd.f32 %v319_v27, %v250_v7  ;;  %v321_v29 = vpop.f32.mrb[7].mxu0  ;;  %424 = vmatmul.mubr.bf16.vlgmr.msra.gmra.mrb[0].mxu1 %v332_v21  ;;  %v328_v31 = vmax.f32 %v316_v24, 0.0 }
  0xf2   : > { %v322_v30 = vadd.f32 %v321_v29, %v254_v8  ;;  %v329_v33 = vmax.f32 %v318_v26, 0.0 }
  0xf3   : > { %v330_v32 = vmax.f32 %v320_v28, 0.0 }
  0xf4   : > { %v331_v34 = vmax.f32 %v322_v30, 0.0 }
  0xf5   : > { %v334_v35 = vpack.c.bf16 %v330_v32, %v328_v31 }
  0xf6   : > { %v335_v36 = vpack.c.bf16 %v331_v34, %v329_v33 }
  0xf8   : > { %431 = vmatprep.mubr.bf16.mxu1 %v335_v36 }
  0xf9   : > { %432 = vmatmul.mubr.bf16.gmra.mrb[4].mxu1 %v334_v35 }
 0x1c4   : > { %v532_v37 = vpop.f32.mrb[0].mxu1 }
 0x1c5   : > { %v533_v39 = vpop.f32.mrb[1].mxu1 }
 0x1c6   : > { %v534_v40 = vadd.f32 %v533_v39, %v532_v37  ;;  %v535_v41 = vpop.f32.mrb[2].mxu1 }
 0x1c7   : > { %v536_v42 = vpop.f32.mrb[3].mxu1 }
 0x1c8   : > { %v426_v43 = vadd.f32 %v534_v40, %v513_v38  ;;  %v537_v44 = vadd.f32 %v536_v42, %v535_v41 }
 0x1ca   : > { %441 = vst.msk [vmem:[%s226_s15] sm:$0xff] %vm440_vm2, %v426_v43  ;;  %v429_v45 = vadd.f32 %v537_v44, %v513_v38 }
 0x1cc   : > { %442 = vst.msk [vmem:[%s226_s15 + $0x8] sm:$0xff] %vm440_vm2, %v429_v45  ;;  %v538_v46 = vpop.f32.mrb[4].mxu1 }
 0x1cd   : > { %v539_v47 = vpop.f32.mrb[5].mxu1 }
 0x1ce   : > { %v540_v48 = vadd.f32 %v539_v47, %v538_v46  ;;  %v541_v49 = vpop.f32.mrb[6].mxu1 }
 0x1cf   : > { %v542_v50 = vpop.f32.mrb[7].mxu1 }
 0x1d0   : > { %v434_v51 = vadd.f32 %v540_v48, %v513_v38  ;;  %v543_v52 = vadd.f32 %v542_v50, %v541_v49 }
 0x1d2   : > { %443 = vst.msk [vmem:[%s226_s15 + $0x10] sm:$0xff] %vm440_vm2, %v434_v51  ;;  %v437_v53 = vadd.f32 %v543_v52, %v513_v38 }
 0x1d4   : > { %444 = vst.msk [vmem:[%s226_s15 + $0x18] sm:$0xff] %vm440_vm2, %v437_v53 }
 0x1d5 PF: > { %s15_s18 = sadd.s32 1, %s559_s18  }
 0x1d6   : > { %p12_p4 = scmp.ge.s32.totalorder %s15_s18, 4  }
 0x1d8   :  { %14 = sbr.rel (!%p12_p4) target bundleno = 1 (0x1), region = 70 }

</bundles_post_ra>
